<compile_context>
chip_gen: v7x
topology: tpu7x:2x2x1
jax: 0.10.0
libtpu: 0.0.40
codegen_flags: <defaults>
</compile_context>

<pallas_src>
import jax
import jax.numpy as jnp
from jax.experimental import pallas as pl
from jax.experimental.pallas import tpu as pltpu

C_PAD = 128          # lane-dense padded feature width (conv channels / classes)


def _cdiv(a, b):
    return (a + b - 1) // b


# ------------------------- Pallas kernel -------------------------

def _make_fused_kernel(B, HW, K):
    inv_hw = 1.0 / HW

    def kernel(p_ref, wcat_ref, bconv_ref, wcomb_ref, bcomb_ref, o_ref):
        # p_ref:     (B, HW, K)      bf16  im2col patches for B samples
        # wcat_ref:  (K, C_PAD)      bf16  3x3 conv weights, K = 9*C_in rows
        # bconv_ref: (1, C_PAD)      f32
        # wcomb_ref: (C_PAD, C_PAD)  bf16  fc @ head fused
        # bcomb_ref: (1, C_PAD)      f32
        # o_ref:     (1, B, C_PAD)   f32

        # 3x3 "same" conv == ONE matmul over the concatenated K dim.
        # Result is consumed directly (register/VMEM single pass) — no
        # per-offset accumulator RMW.
        patches = p_ref[...].reshape(B * HW, K)                       # bf16
        conv = jnp.dot(patches, wcat_ref[...],
                       preferred_element_type=jnp.float32)            # (B*HW, C_PAD)
        relu = jnp.maximum(conv + bconv_ref[...], 0.0)                # f32

        # Global average pool as an MXU matmul (no cross-sublane reduce):
        # pool_mat[b, r] = 1/HW  iff row r belongs to sample b.
        row = jax.lax.broadcasted_iota(jnp.int32, (B, B * HW), 1)
        samp = jax.lax.broadcasted_iota(jnp.int32, (B, B * HW), 0)
        in_sample = (row >= samp * HW) & (row < (samp + 1) * HW)
        pool_mat = jnp.where(in_sample, inv_hw, 0.0)                  # f32
        pooled = jnp.dot(pool_mat, relu,
                         preferred_element_type=jnp.float32)          # (B, C_PAD)

        # backbone.fc + CL head fused into one (B,128)@(128,128) matmul.
        logits = jnp.dot(pooled.astype(jnp.bfloat16), wcomb_ref[...],
                         preferred_element_type=jnp.float32) + bcomb_ref[...]
        o_ref[0] = logits                                             # (B, C_PAD)

    return kernel


# ------------------------- parameter / input prep -------------------------

def _im2col(x_nchw):
    """(N, C, H, W) -> (N, H*W, 9*C) patches for a 3x3 'SAME' conv."""
    N, C, H, W = x_nchw.shape
    xp = jnp.pad(x_nchw, ((0, 0), (0, 0), (1, 1), (1, 1)))
    cols = [xp[:, :, dh:dh + H, dw:dw + W] for dh in range(3) for dw in range(3)]
    patches = jnp.stack(cols, axis=1)                    # (N, 9, C, H, W)
    patches = jnp.transpose(patches, (0, 3, 4, 1, 2))    # (N, H, W, 9, C)
    return patches.reshape(N, H * W, 9 * C)


def prepare_params(w_conv_pt, b_conv, w_fc_pt, b_fc, w_head_pt, b_head):
    """Fold / pad PyTorch-layout params into kernel-friendly operands.

    NOTE (continual learning): w_comb/b_comb algebraically fuse backbone.fc
    with the CL head -> this MUST be re-run after every fc/head weight update
    or the kernel silently serves stale logits.
    """
    hp = jax.lax.Precision.HIGHEST
    C_mid, C_in, KH, KW = w_conv_pt.shape
    assert (KH, KW) == (3, 3)
    F = w_fc_pt.shape[0]
    NC = w_head_pt.shape[0]
    assert C_mid <= C_PAD, f"conv output channels {C_mid} > {C_PAD}"
    assert NC <= C_PAD, f"num_classes {NC} > {C_PAD}"
    # (K = 9*C_in is a matmul contraction dim and has no 128-lane constraint.)

    # Concatenated-K conv weight:
    #   wcat[(dh*3+dw)*C_in + ci, c_out] = W[c_out, ci, dh, dw]
    w_cat = jnp.transpose(w_conv_pt, (2, 3, 1, 0)).reshape(9 * C_in, C_mid)
    w_cat = jnp.pad(w_cat, ((0, 0), (0, C_PAD - C_mid))).astype(jnp.bfloat16)
    b_conv_p = jnp.pad(b_conv.reshape(1, C_mid),
                       ((0, 0), (0, C_PAD - C_mid))).astype(jnp.float32)

    # fc and head fused (no nonlinearity between them):
    #   logits = pooled @ (w_fc^T @ w_head^T) + (b_fc @ w_head^T + b_head)
    w_comb = jnp.dot(w_fc_pt.T, w_head_pt.T, precision=hp)            # (C_mid, NC)
    b_comb = (jnp.dot(b_fc.reshape(1, F), w_head_pt.T, precision=hp)
              + b_head.reshape(1, NC))
    w_comb_p = jnp.pad(w_comb, ((0, C_PAD - C_mid),
                                (0, C_PAD - NC))).astype(jnp.bfloat16)
    b_comb_p = jnp.pad(b_comb, ((0, 0), (0, C_PAD - NC))).astype(jnp.float32)
    return w_cat, b_conv_p, w_comb_p, b_comb_p, NC


# ------------------------- forward wrapper -------------------------

def continual_learner_forward(x_nchw, prepped, batch_block=None):
    w_cat, b_conv_p, w_comb_p, b_comb_p, num_classes = prepped
    N, C_in, H, W = x_nchw.shape
    HW = H * W
    K = 9 * C_in

    # Batch blocking: B samples per grid step; keep >= 2 grid steps when N
    # allows so both v7x TensorCores get work.
    if batch_block is None:
        B = min(8, N)
        if N > 1 and _cdiv(N, B) < 2:
            B = _cdiv(N, 2)
    else:
        B = batch_block
    n_blocks = _cdiv(N, B)
    N_pad = n_blocks * B

    # Host-side im2col-lite in bf16 (~18 KB/sample at 16x16x4): makes the conv
    # a single K=9*C_in matmul and gives the kernel a contraction-friendly
    # layout instead of a 4-wide lane-sparse channel dim.
    patches = _im2col(x_nchw).astype(jnp.bfloat16)                 # (N, HW, K)
    if N_pad != N:
        patches = jnp.pad(patches, ((0, N_pad - N), (0, 0), (0, 0)))

    kernel = _make_fused_kernel(B, HW, K)

    # Conservative VMEM budget check (double-buffered blocks + f32 conv/ReLU
    # temporaries + pool matrix + constants), vs the smallest default scoped
    # limit (16 MiB on v5e; v7x physical VMEM is 64 MiB).
    vmem_bytes = 2 * (2 * B * HW * K * 2              # patches (bf16, dbl-buffered)
                      + 2 * B * C_PAD * 4             # output (f32, dbl-buffered)
                      + 2 * (K * C_PAD * 2 + C_PAD * C_PAD * 2 + 2 * C_PAD * 4)
                      + 2 * B * HW * C_PAD * 4        # conv + relu f32 values
                      + B * B * HW * 4)               # pool matrix
    assert vmem_bytes < 16 * 1024 * 1024, f"VMEM budget exceeded: {vmem_bytes} B"

    out = pl.pallas_call(
        kernel,
        out_shape=jax.ShapeDtypeStruct((n_blocks, B, C_PAD), jnp.float32),
        grid=(n_blocks,),
        in_specs=[
            pl.BlockSpec((B, HW, K), lambda n: (n, 0, 0)),
            # Grid-invariant operands (constant index_map): ~75 KB total, so
            # the default double-buffering is negligible at these sizes.
            pl.BlockSpec((K, C_PAD), lambda n: (0, 0)),
            pl.BlockSpec((1, C_PAD), lambda n: (0, 0)),
            pl.BlockSpec((C_PAD, C_PAD), lambda n: (0, 0)),
            pl.BlockSpec((1, C_PAD), lambda n: (0, 0)),
        ],
        out_specs=pl.BlockSpec((1, B, C_PAD), lambda n: (n, 0, 0)),
        compiler_params=pltpu.CompilerParams(
            dimension_semantics=("parallel",)),
    )(patches, w_cat, b_conv_p, w_comb_p, b_comb_p)

    return out.reshape(N_pad, C_PAD)[:N, :num_classes]


# ------------------------- pure-JAX reference -------------------------

def _reference_forward(x_nchw, w_conv_pt, b_conv, w_fc_pt, b_fc, w_head_pt, b_head):
    hp = jax.lax.Precision.HIGHEST
    conv = jax.lax.conv_general_dilated(
        x_nchw, w_conv_pt, window_strides=(1, 1), padding="SAME",
        dimension_numbers=("NCHW", "OIHW", "NCHW"), precision=hp)
    conv = jnp.maximum(conv + b_conv.reshape(1, -1, 1, 1), 0.0)
    pooled = conv.mean(axis=(2, 3))                                # (N, C_mid)
    feats = jnp.dot(pooled, w_fc_pt.T, precision=hp) + b_fc.reshape(1, -1)
    return jnp.dot(feats, w_head_pt.T, precision=hp) + b_head.reshape(1, -1)


# ------------------------- main -------------------------

if __name__ == "__main__":
    N, C_IN, H, W = 2, 4, 16, 16       # input images (NCHW, like PyTorch)
    C_MID = 8                          # conv output channels
    F = 32                             # backbone.fc.out_features
    NUM_CLASSES = 10                   # head output

    key = jax.random.PRNGKey(0)
    k = jax.random.split(key, 7)

    x = jax.random.normal(k[0], (N, C_IN, H, W), jnp.float32)

    # PyTorch-layout parameters (deterministic).
    w_conv_pt = 0.1 * jax.random.normal(k[1], (C_MID, C_IN, 3, 3), jnp.float32)
    b_conv = 0.01 * jax.random.normal(k[2], (C_MID,), jnp.float32)
    w_fc_pt = 0.1 * jax.random.normal(k[3], (F, C_MID), jnp.float32)
    b_fc = 0.01 * jax.random.normal(k[4], (F,), jnp.float32)
    w_head_pt = 0.1 * jax.random.normal(k[5], (NUM_CLASSES, F), jnp.float32)
    b_head = 0.01 * jax.random.normal(k[6], (NUM_CLASSES,), jnp.float32)

    prepped = prepare_params(w_conv_pt, b_conv, w_fc_pt, b_fc, w_head_pt, b_head)

    logits = continual_learner_forward(x, prepped)
    logits = jax.block_until_ready(logits)

    ref = _reference_forward(x, w_conv_pt, b_conv, w_fc_pt, b_fc,
                             w_head_pt, b_head)
    assert logits.shape == (N, NUM_CLASSES)
    max_diff = float(jnp.max(jnp.abs(logits - ref)))
    # bf16 MXU operands vs an f32 HIGHEST-precision reference -> loosened tol.
    assert jnp.allclose(logits, ref, atol=1e-2, rtol=1e-2), (
        f"mismatch vs reference, max abs diff {max_diff}")

    # TODO(synk): add_to_buffer / sample_buffer are host-side replay-buffer
    # bookkeeping (python lists + RNG), not device compute; no kernel needed.
    print("KERNEL_OK")
</pallas_src>

<mosaic_0001>
module attributes {stable_mosaic.version = 11 : i64} {
  func.func @kernel(%arg0: i32, %arg1: memref<1x256x36xbf16, #tpu.memory_space<vmem>>, %arg2: memref<36x128xbf16, #tpu.memory_space<vmem>>, %arg3: memref<1x128xf32, #tpu.memory_space<vmem>>, %arg4: memref<128x128xbf16, #tpu.memory_space<vmem>>, %arg5: memref<1x128xf32, #tpu.memory_space<vmem>>, %arg6: memref<1x1x128xf32, #tpu.memory_space<vmem>>) attributes {dimension_semantics = [#tpu.dimension_semantics<parallel>], iteration_bounds = array<i64: 2>, scalar_prefetch = 0 : i64, scratch_operands = 0 : i64, tpu.core_type = #tpu.core_type<tc>, window_params = [{transform_indices = @transform_0, window_bounds = array<i64: 1, 256, 36>}, {pipeline_mode = #tpu.pipeline_mode<synchronous>, transform_indices = @transform_1, window_bounds = array<i64: 36, 128>}, {pipeline_mode = #tpu.pipeline_mode<synchronous>, transform_indices = @transform_2, window_bounds = array<i64: 1, 128>}, {pipeline_mode = #tpu.pipeline_mode<synchronous>, transform_indices = @transform_3, window_bounds = array<i64: 128, 128>}, {pipeline_mode = #tpu.pipeline_mode<synchronous>, transform_indices = @transform_4, window_bounds = array<i64: 1, 128>}, {transform_indices = @transform_5, window_bounds = array<i64: 1, 1, 128>}]} {
    %c0 = arith.constant 0 : index
    %c0_0 = arith.constant 0 : index
    %c0_1 = arith.constant 0 : index
    %0 = vector.load %arg1[%c0, %c0_0, %c0_1] : memref<1x256x36xbf16, #tpu.memory_space<vmem>>, vector<1x256x36xbf16>
    %1 = vector.shape_cast %0 : vector<1x256x36xbf16> to vector<256x36xbf16>
    %c0_2 = arith.constant 0 : index
    %c0_3 = arith.constant 0 : index
    %2 = vector.load %arg2[%c0_2, %c0_3] : memref<36x128xbf16, #tpu.memory_space<vmem>>, vector<36x128xbf16>
    %cst = arith.constant dense<0.000000e+00> : vector<256x128xf32>
    %3 = tpu.matmul %1, %2, %cst {dimension_numbers = #tpu.dot_dimension_numbers<[1], [0], [0], [1], [0, 0, 1, 1], [], []>} : vector<256x36xbf16>, vector<36x128xbf16>, vector<256x128xf32> -> vector<256x128xf32>
    %c0_4 = arith.constant 0 : index
    %c0_5 = arith.constant 0 : index
    %4 = vector.load %arg3[%c0_4, %c0_5] : memref<1x128xf32, #tpu.memory_space<vmem>>, vector<1x128xf32>
    %5 = vector.broadcast %4 : vector<1x128xf32> to vector<256x128xf32>
    %6 = arith.addf %3, %5 : vector<256x128xf32>
    %cst_6 = arith.constant 0.000000e+00 : f32
    %7 = vector.broadcast %cst_6 : f32 to vector<256x128xf32>
    %8 = arith.maximumf %6, %7 : vector<256x128xf32>
    %9 = tpu.iota {dimensions = array<i32: 1>} : vector<1x256xi32>
    %10 = tpu.iota {dimensions = array<i32: 0>} : vector<1x256xi32>
    %c256_i32 = arith.constant 256 : i32
    %11 = vector.broadcast %c256_i32 : i32 to vector<1x256xi32>
    %12 = arith.muli %10, %11 : vector<1x256xi32>
    %13 = arith.cmpi sge, %9, %12 : vector<1x256xi32>
    %c1_i32 = arith.constant 1 : i32
    %14 = vector.broadcast %c1_i32 : i32 to vector<1x256xi32>
    %15 = arith.addi %10, %14 : vector<1x256xi32>
    %c256_i32_7 = arith.constant 256 : i32
    %16 = vector.broadcast %c256_i32_7 : i32 to vector<1x256xi32>
    %17 = arith.muli %15, %16 : vector<1x256xi32>
    %18 = arith.cmpi slt, %9, %17 : vector<1x256xi32>
    %19 = arith.andi %13, %18 : vector<1x256xi1>
    %cst_8 = arith.constant 3.906250e-03 : f32
    %cst_9 = arith.constant 0.000000e+00 : f32
    %20 = vector.broadcast %cst_8 : f32 to vector<1x256xf32>
    %21 = vector.broadcast %cst_9 : f32 to vector<1x256xf32>
    %22 = arith.select %19, %20, %21 : vector<1x256xi1>, vector<1x256xf32>
    %cst_10 = arith.constant dense<0.000000e+00> : vector<1x128xf32>
    %23 = tpu.matmul %22, %8, %cst_10 {dimension_numbers = #tpu.dot_dimension_numbers<[1], [0], [0], [1], [0, 0, 1, 1], [], []>} : vector<1x256xf32>, vector<256x128xf32>, vector<1x128xf32> -> vector<1x128xf32>
    %24 = arith.truncf %23 : vector<1x128xf32> to vector<1x128xbf16>
    %c0_11 = arith.constant 0 : index
    %c0_12 = arith.constant 0 : index
    %25 = vector.load %arg4[%c0_11, %c0_12] : memref<128x128xbf16, #tpu.memory_space<vmem>>, vector<128x128xbf16>
    %cst_13 = arith.constant dense<0.000000e+00> : vector<1x128xf32>
    %26 = tpu.matmul %24, %25, %cst_13 {dimension_numbers = #tpu.dot_dimension_numbers<[1], [0], [0], [1], [0, 0, 1, 1], [], []>} : vector<1x128xbf16>, vector<128x128xbf16>, vector<1x128xf32> -> vector<1x128xf32>
    %c0_14 = arith.constant 0 : index
    %c0_15 = arith.constant 0 : index
    %27 = vector.load %arg5[%c0_14, %c0_15] : memref<1x128xf32, #tpu.memory_space<vmem>>, vector<1x128xf32>
    %28 = arith.addf %26, %27 : vector<1x128xf32>
    %c0_16 = arith.constant 0 : index
    %c0_17 = arith.constant 0 : index
    %c0_18 = arith.constant 0 : index
    %29 = vector.load %arg6[%c0_16, %c0_17, %c0_18] : memref<1x1x128xf32, #tpu.memory_space<vmem>>, vector<1x1x128xf32>
    %30 = vector.shape_cast %29 : vector<1x1x128xf32> to vector<1x128xf32>
    %31 = vector.shape_cast %28 : vector<1x128xf32> to vector<1x1x128xf32>
    tpu.vector_store %arg6[%c0_16, %c0_17, %c0_18], %31 {strides = array<i32>} : memref<1x1x128xf32, #tpu.memory_space<vmem>>, vector<1x1x128xf32>,
    return
  }
  func.func @transform_0(%arg0: i32) -> (i32, i32, i32) {
    %c0_i32 = arith.constant 0 : i32
    %c0_i32_0 = arith.constant 0 : i32
    %c0_i32_1 = arith.constant 0 : i32
    return %arg0, %c0_i32, %c0_i32_0 : i32, i32, i32
  }
  func.func @transform_1(%arg0: i32) -> (i32, i32) {
    %c0_i32 = arith.constant 0 : i32
    %c0_i32_0 = arith.constant 0 : i32
    %c0_i32_1 = arith.constant 0 : i32
    return %c0_i32, %c0_i32_0 : i32, i32
  }
  func.func @transform_2(%arg0: i32) -> (i32, i32) {
    %c0_i32 = arith.constant 0 : i32
    %c0_i32_0 = arith.constant 0 : i32
    %c0_i32_1 = arith.constant 0 : i32
    return %c0_i32, %c0_i32_0 : i32, i32
  }
  func.func @transform_3(%arg0: i32) -> (i32, i32) {
    %c0_i32 = arith.constant 0 : i32
    %c0_i32_0 = arith.constant 0 : i32
    %c0_i32_1 = arith.constant 0 : i32
    return %c0_i32, %c0_i32_0 : i32, i32
  }
  func.func @transform_4(%arg0: i32) -> (i32, i32) {
    %c0_i32 = arith.constant 0 : i32
    %c0_i32_0 = arith.constant 0 : i32
    %c0_i32_1 = arith.constant 0 : i32
    return %c0_i32, %c0_i32_0 : i32, i32
  }
  func.func @transform_5(%arg0: i32) -> (i32, i32, i32) {
    %c0_i32 = arith.constant 0 : i32
    %c0_i32_0 = arith.constant 0 : i32
    %c0_i32_1 = arith.constant 0 : i32
    return %arg0, %c0_i32, %c0_i32_0 : i32, i32, i32
  }
}

</mosaic_0001>

<bundles_post_ra>
// kernel: tpu_custom_call.1
= control target key start
LH: loop header
LB: loop body
LE: loop exit
PB: predicated region body
PF: predicated region fallthrough
CT: control target
= control target key end

     0   :  { %10 = vsyncpa [#allocation3], 0  ;;  %s1496_s0 = inlined_call_operand.vmem [shape: bf16[2,256,36], index: 0, kind: input, shape index: {}]   ;;  %s1497_s1 = inlined_call_operand.vmem [shape: bf16[36,128], index: 1, kind: input, shape index: {}]   ;;  %s1498_s2 = inlined_call_operand.vmem [shape: f32[1,128], index: 2, kind: input, shape index: {}]   ;;  %s1499_s3 = inlined_call_operand.vmem [shape: bf16[128,128], index: 3, kind: input, shape index: {}]   ;;  %s1500_s4 = inlined_call_operand.vmem [shape: f32[1,128], index: 4, kind: input, shape index: {}]   ;;  %s1501_s5 = inlined_call_operand.hbm [shape: f32[2,1,128], index: 5, kind: output, shape index: {}]  }
   0x1   :  { %12 = vsyncpa [#allocation3 + $0x1], 0  ;;  %s1246_s18 = smov 0   ;;  %s1248_s19 = smov 0  }
   0x2   :  { %s1250_s20 = smov 0   ;;  %s1252_s21 = smov 0  }
   0x3 LB: > { %s1267_s22 = sadd.s32 4294967295, %s1210_s21   ;;  %s869_s23 = sadd.s32 4294967294, %s1210_s21   ;;  %s1210_s21 = sphi %s1252_s21, %s1511_s21   ;;  %s1206_s20 = sphi %s1250_s20, %s1510_s20   ;;  %s1202_s19 = sphi %s1248_s19, %s1509_s19   ;;  %s1198_s18 = sphi %s1246_s18, %s1508_s18  }
   0x4   : > { %s1271_s24 = sadd.s32 1, %s1210_s21   ;;  %s135_s25 = sadd.s32 1, %s1206_s20 }
   0x5   : > { %s132_s26 = ssub.s32 %s1210_s21, %s1271_s24  ;;  %p145_p0 = scmp.ne.s32.totalorder %s1206_s20, %s1202_s19 }
   0x6   : > { %p133_p1 = scmp.eq.s32.totalorder %s132_s26, 0  ;;  %p146_p2 = scmp.eq.s32.totalorder %s1267_s22, 1 }
   0x7   : > { %p151_p3 = scmp.ne.s32.totalorder %s1202_s19, %s1198_s18  ;;  %p152_p4 = scmp.eq.s32.totalorder %s869_s23, 1 }
   0x8   : > { %s1282_s27 = scalar_select %p133_p1, %s1206_s20, %s135_s25  }
   0x9   : > { %p1284_p5 = por %p146_p2, %p145_p0  ;;  %p1288_p6 = por %p152_p4, %p151_p3 }
   0xa   : > { %p872_p7 = scmp.ge.s32.totalorder %s1210_s21, 1  ;;  %p190_p8 = scmp.lt.s32.totalorder %s1210_s21, 3 }
   0xc   : > { %p191_p9 = pnand %p872_p7, %p190_p8 }
   0xd   : > { %v1121_v0 = vld [vmem:[%s1497_s1] sm:$0xff] (!%p191_p9)   ;;  %v1122_v1 = vld [vmem:[%s1497_s1 + $0x8] sm:$0xff] (!%p191_p9)   ;;  %p217_p10 = scmp.lt.s32.totalorder (!%p191_p9), %s1267_s22, 1  ;;  %v1123_v2 = vld [vmem:[%s1497_s1 + $0x10] ss:$0 sps:$4 sm:$0x33] (!%p191_p9)   ;;  %v608_v20 = vlaneseq (!%p191_p9) }
   0xe   : > { %194 = sbr.rel (%p191_p9) target bundleno = 757 (0x2f5), region = 40  ;;  %988 = vmatprep.subr.bf16.mxu0 (!%p191_p9), %v1121_v0  ;;  %vm411_vm0 = vcmask (!%p191_p9), 1041408   ;;  %vm362_vm1 = vcmask (!%p191_p9), 293888   ;;  %v1212_v29 = vmov (!%p191_p9), 0.00390625   ;;  %v1358_v30 = vld [vmem:[%s1498_s2] ss:$0 sm:$0xff] (!%p191_p9) }
   0xf   : > { %989 = vmatpush3.bf16.msra.mxu0 (!%p191_p9), %v1121_v0  ;;  %v413_v4 = vsel (!%p191_p9), %vm411_vm0, %v1123_v2, 0  ;;  %v612_v21 = vshrl.u32 (!%p191_p9), %v608_v20, 7  ;;  %v609_v22 = vand.u32 (!%p191_p9), 127, %v608_v20  ;;  %v1143_v27 = vld [vmem:[%s1499_s3 + $0x18] sm:$0xff] (!%p191_p9)   ;;  %v1144_v28 = vld [vmem:[%s1499_s3 + $0x20] sm:$0xff] (!%p191_p9)   ;;  %vm1214_vm8 = vmmov (!%p191_p9), 0  }
  0x10   : > { %990 = vmatprep.subr.bf16.mxu0 (!%p191_p9), %v1122_v1  ;;  %s215_s23 = sand.u32 (!%p191_p9), 1, %s1202_s19   ;;  %s921_s30 = sshll.u32 (!%p191_p9), %s1267_s22, 4 }
  0x11   : > { %v616_v23 = vadd.s32 (!%p191_p9), 1, %v612_v21  ;;  %v610_v24 = vadd.s32 (!%p191_p9), 128, %v609_v22  ;;  %v613_v25 = vmul.u32 (!%p191_p9), 256, %v612_v21  ;;  %s216_s6 = scalar_lea.vmem (!%p191_p9), [#allocation2], %s215_s23  ;;  %s1454_s10 = scalar_lea.hbm (!%p191_p9), %s1501_s5, %s921_s30 }
  0x12   : > { %s814_s7 = sshll.u32 (!%p191_p9), %s216_s6, 4  ;;  %s1456_s7 = int_to_ptr.vmem [resolvable:$true] %s814_s7 }
  0x13   : > { %991 = vmatpush3.bf16.msra.mxu0 (!%p191_p9), %v1122_v1  ;;  %v617_v26 = vmul.u32 (!%p191_p9), 256, %v616_v23  ;;  %vm615_vm2 = vcmp.ge.s32.totalorder (!%p191_p9), %v610_v24, %v613_v25  ;;  %vm1342_vm4 = vcmp.ge.s32.totalorder (!%p191_p9), %v609_v22, %v613_v25 }
  0x14   : > { %1078 = vmatprep.subr.msk.bf16.mxu0 (!%p191_p9), %vm411_vm0, %v1123_v2 }
  0x15   : > { %s218_s11 = scalar_select %p217_p10, %s1267_s22, 1  ;;  %vm619_vm3 = vcmp.lt.s32.totalorder %v610_v24, %v617_v26  ;;  %vm1346_vm6 = vcmp.lt.s32.totalorder %v609_v22, %v617_v26 }
  0x16   : > { %vm621_vm5 = vmand %vm615_vm2, %vm619_vm3  ;;  %s1148_s22 = scalar_lea.vmem %s1456_s7, 16 }
  0x17   : > { %s924_s12 = sshll.u32 %s218_s11, 7  ;;  %993 = vmatpush3.bf16.msra.mxu0 %v413_v4  ;;  %911 = vmatprep.mubr.msk.f32.mxu1 %vm621_vm5, %v1212_v29  ;;  %vm620_vm7 = vmand %vm1342_vm4, %vm1346_vm6  ;;  %s802_s11 = scalar_lea.sflag [#allocation3], %s215_s23 }
  0x18   : > { %s1308_s15 = scalar_lea.vmem %s1496_s0, %s924_s12  ;;  %p1149_p11 = scmp.ne.s32.totalorder %s1456_s7, %s1148_s22 }
  0x19   : > { %v1124_v3 = vld [vmem:[%s1308_s15] sm:$0xff]   ;;  %v1125_v5 = vld [vmem:[%s1308_s15 + $0x8] sm:$0xff]   ;;  %v1126_v6 = vld [vmem:[%s1308_s15 + $0x10] sm:$0xff]   ;;  %s1215_s12 = smov [#allocation2]  }
  0x1a   : > { %994 = vmatprep.mubr.msk.bf16.mxu0 %vm362_vm1, %v1124_v3  ;;  %v1127_v7 = vld [vmem:[%s1308_s15 + $0x18] sm:$0xff]   ;;  %v1128_v8 = vld [vmem:[%s1308_s15 + $0x20] sm:$0xff]   ;;  %v1129_v9 = vld [vmem:[%s1308_s15 + $0x28] sm:$0xff]   ;;  %p1150_p12 = pnand %p1149_p11, %p1284_p5  ;;  %s1152_s13 = sshll.u32 %s1215_s12, 4  ;;  %s1153_s13 = int_to_ptr.vmem [resolvable:$false] %s1152_s13 }
  0x1b   : > { %995 = vmatmul.mubr.msk.bf16.vlgmr.msra.gmra.mrb[0].mxu0 %vm362_vm1, %v1125_v5  ;;  %v1130_v10 = vld [vmem:[%s1308_s15 + $0x30] sm:$0xff]   ;;  %v1131_v11 = vld [vmem:[%s1308_s15 + $0x38] sm:$0xff]   ;;  %v1132_v12 = vld [vmem:[%s1308_s15 + $0x40] sm:$0xff]   ;;  %s1154_s14 = scalar_lea.vmem %s1153_s13, 32  ;;  %p1155_p0 = scmp.lt.s32.totalorder %s1456_s7, %s1153_s13 }
  0x1c   : > { %998 = vmatprep.mubr.msk.bf16.mxu0 %vm362_vm1, %v1126_v6  ;;  %v1133_v13 = vld [vmem:[%s1308_s15 + $0x48] sm:$0xff]   ;;  %v1134_v14 = vld [vmem:[%s1308_s15 + $0x50] sm:$0xff]   ;;  %v1135_v15 = vld [vmem:[%s1308_s15 + $0x58] sm:$0xff]   ;;  %p1151_p13 = pneg %p1150_p12  ;;  %p1156_p1 = scmp.lt.s32.totalorder %s1154_s14, %s1148_s22 }
  0x1d   : > { %v1136_v16 = vld [vmem:[%s1308_s15 + $0x60] sm:$0xff]   ;;  %v1137_v17 = vld [vmem:[%s1308_s15 + $0x68] sm:$0xff]   ;;  %v1138_v18 = vld [vmem:[%s1308_s15 + $0x70] sm:$0xff]  }
  0x1e   : > { %v1139_v19 = vld [vmem:[%s1308_s15 + $0x78] sm:$0xff]   ;;  %p1157_p2 = por %p1156_p1, %p1155_p0 }
  0x20   : > { %p1158_p3 = pnand %p1157_p2, %p1151_p13 }
  0x23   : > { %999 = vmatmul.mubr.msk.bf16.gmra.mrb[4].mxu0 %vm362_vm1, %v1127_v7 }
  0x24   : > { %1002 = vmatprep.mubr.msk.bf16.mxu0 %vm362_vm1, %v1128_v8 }
  0x2b   : > { %1003 = vmatmul.mubr.msk.bf16.gmra.mrb[8].mxu0 %vm362_vm1, %v1129_v9 }
  0x2c   : > { %1006 = vmatprep.mubr.msk.bf16.mxu0 %vm362_vm1, %v1130_v10 }
  0x33   : > { %1007 = vmatmul.mubr.msk.bf16.gmra.mrb[12].mxu0 %vm362_vm1, %v1131_v11 }
  0x34   : > { %1010 = vmatprep.mubr.msk.bf16.mxu0 %vm362_vm1, %v1132_v12 }
  0x3b   : > { %1011 = vmatmul.mubr.msk.bf16.gmra.mrb[16].mxu0 %vm362_vm1, %v1133_v13 }
  0x3c   : > { %1014 = vmatprep.mubr.msk.bf16.mxu0 %vm362_vm1, %v1134_v14 }
  0x43   : > { %1015 = vmatmul.mubr.msk.bf16.gmra.mrb[20].mxu0 %vm362_vm1, %v1135_v15 }
  0x44   : > { %1018 = vmatprep.mubr.msk.bf16.mxu0 %vm362_vm1, %v1136_v16 }
  0x4b   : > { %1019 = vmatmul.mubr.msk.bf16.gmra.mrb[24].mxu0 %vm362_vm1, %v1137_v17 }
  0x4c   : > { %1022 = vmatprep.mubr.msk.bf16.mxu0 %vm362_vm1, %v1138_v18 }
  0x53   : > { %1023 = vmatmul.mubr.msk.bf16.gmra.mrb[28].mxu0 %vm362_vm1, %v1139_v19 }
  0xee   : > { %v996_v31 = vpop.f32.mrb[0].mxu0 }
  0xef   : > { %v458_v32 = vadd.f32 %v996_v31, %v1358_v30  ;;  %v449_v33 = vpop.f32.mrb[1].mxu0 }
  0xf0   : > { %v450_v34 = vadd.f32 %v1358_v30, %v449_v33  ;;  %v997_v35 = vpop.f32.mrb[2].mxu0 }
  0xf1   : > { %v461_v36 = vadd.f32 %v997_v35, %v1358_v30  ;;  %v452_v37 = vpop.f32.mrb[3].mxu0  ;;  %v578_v39 = vmax.f32 %v458_v32, 0.0 }
  0xf2   : > { %v453_v38 = vadd.f32 %v1358_v30, %v452_v37  ;;  %v576_v41 = vmax.f32 %v450_v34, 0.0 }
  0xf3   : > { %v579_v40 = vmax.f32 %v461_v36, 0.0 }
  0xf4   : > { %v577_v42 = vmax.f32 %v453_v38, 0.0 }
  0xf5   : > { %v1364_v43 = vpack.c.bf16 %v579_v40, %v578_v39 }
  0xf6   : > { %v1000_v44 = vpop.f32.mrb[4].mxu0  ;;  %v1366_v45 = vpack.c.bf16 %v577_v42, %v576_v41 }
  0xf7   : > { %v474_v46 = vadd.f32 %v1000_v44, %v1358_v30  ;;  %v465_v47 = vpop.f32.mrb[5].mxu0 }
  0xf8   : > { %v466_v48 = vadd.f32 %v1358_v30, %v465_v47  ;;  %v1001_v49 = vpop.f32.mrb[6].mxu0 }
  0xf9   : > { %v477_v50 = vadd.f32 %v1001_v49, %v1358_v30  ;;  %v468_v51 = vpop.f32.mrb[7].mxu0  ;;  %v582_v53 = vmax.f32 %v474_v46, 0.0 }
  0xfa   : > { %v469_v52 = vadd.f32 %v1358_v30, %v468_v51  ;;  %v580_v55 = vmax.f32 %v466_v48, 0.0 }
  0xfb   : > { %v583_v54 = vmax.f32 %v477_v50, 0.0 }
  0xfc   : > { %v581_v56 = vmax.f32 %v469_v52, 0.0 }
  0xfd   : > { %v1372_v57 = vpack.c.bf16 %v583_v54, %v582_v53 }
  0xfe   : > { %v1374_v58 = vpack.c.bf16 %v581_v56, %v580_v55  ;;  %v1004_v59 = vpop.f32.mrb[8].mxu0 }
  0xff   : > { %v490_v60 = vadd.f32 %v1004_v59, %v1358_v30  ;;  %v481_v61 = vpop.f32.mrb[9].mxu0 }
 0x100   : > { %v482_v62 = vadd.f32 %v1358_v30, %v481_v61  ;;  %v1005_v63 = vpop.f32.mrb[10].mxu0 }
 0x101   : > { %v493_v0 = vadd.f32 %v1005_v63, %v1358_v30  ;;  %v484_v1 = vpop.f32.mrb[11].mxu0  ;;  %v586_v3 = vmax.f32 %v490_v60, 0.0 }
 0x102   : > { %v485_v2 = vadd.f32 %v1358_v30, %v484_v1  ;;  %v584_v5 = vmax.f32 %v482_v62, 0.0 }
 0x103   : > { %v587_v4 = vmax.f32 %v493_v0, 0.0 }
 0x104   : > { %v585_v6 = vmax.f32 %v485_v2, 0.0 }
 0x105   : > { %v1380_v7 = vpack.c.bf16 %v587_v4, %v586_v3 }
 0x106   : > { %v1382_v8 = vpack.c.bf16 %v585_v6, %v584_v5  ;;  %v1008_v9 = vpop.f32.mrb[12].mxu0 }
 0x107   : > { %v506_v10 = vadd.f32 %v1008_v9, %v1358_v30  ;;  %v497_v11 = vpop.f32.mrb[13].mxu0 }
 0x108   : > { %v498_v12 = vadd.f32 %v1358_v30, %v497_v11  ;;  %v1009_v13 = vpop.f32.mrb[14].mxu0 }
 0x109   : > { %v509_v14 = vadd.f32 %v1009_v13, %v1358_v30  ;;  %v500_v15 = vpop.f32.mrb[15].mxu0  ;;  %v590_v17 = vmax.f32 %v506_v10, 0.0 }
 0x10a   : > { %v501_v16 = vadd.f32 %v1358_v30, %v500_v15  ;;  %v588_v19 = vmax.f32 %v498_v12, 0.0 }
 0x10b   : > { %v591_v18 = vmax.f32 %v509_v14, 0.0 }
 0x10c   : > { %v589_v20 = vmax.f32 %v501_v16, 0.0 }
 0x10d   : > { %v1388_v21 = vpack.c.bf16 %v591_v18, %v590_v17 }
 0x10e   : > { %v1390_v22 = vpack.c.bf16 %v589_v20, %v588_v19  ;;  %v1012_v23 = vpop.f32.mrb[16].mxu0 }
 0x10f   : > { %v522_v24 = vadd.f32 %v1012_v23, %v1358_v30  ;;  %v513_v25 = vpop.f32.mrb[17].mxu0  ;;  %v1147_v23 = vld [vmem:[%s1499_s3 + $0x38] sm:$0xff]  }
 0x110   : > { %v514_v26 = vadd.f32 %v1358_v30, %v513_v25  ;;  %v1013_v31 = vpop.f32.mrb[18].mxu0 }
 0x111   : > { %v525_v32 = vadd.f32 %v1013_v31, %v1358_v30  ;;  %v516_v33 = vpop.f32.mrb[19].mxu0  ;;  %v594_v35 = vmax.f32 %v522_v24, 0.0 }
 0x112   : > { %v517_v34 = vadd.f32 %v1358_v30, %v516_v33  ;;  %v592_v37 = vmax.f32 %v514_v26, 0.0 }
 0x113   : > { %v595_v36 = vmax.f32 %v525_v32, 0.0  ;;  %v711_v32 = vld [vmem:[%s1500_s4] sm:$0x1] }
 0x114   : > { %v593_v38 = vmax.f32 %v517_v34, 0.0 }
 0x115   : > { %v1050_v39 = vpack.c.bf16 %v595_v36, %v594_v35 }
 0x116   : > { %v1016_v40 = vpop.f32.mrb[20].mxu0  ;;  %v1046_v41 = vpack.c.bf16 %v593_v38, %v592_v37 }
 0x117   : > { %v538_v42 = vadd.f32 %v1016_v40, %v1358_v30  ;;  %v529_v44 = vpop.f32.mrb[21].mxu0 }
 0x118   : > { %v530_v46 = vadd.f32 %v1358_v30, %v529_v44  ;;  %v1017_v47 = vpop.f32.mrb[22].mxu0  ;;  %1047 = vmatprep.subr.bf16.mxu1 %v1046_v41 }
 0x119   : > { %v541_v48 = vadd.f32 %v1017_v47, %v1358_v30  ;;  %v532_v49 = vpop.f32.mrb[23].mxu0  ;;  %1049 = vmatpush3.bf16.msra.mxu1 %v1366_v45  ;;  %v598_v51 = vmax.f32 %v538_v42, 0.0 }
 0x11a   : > { %v533_v50 = vadd.f32 %v1358_v30, %v532_v49  ;;  %1051 = vmatprep.subr.bf16.mxu1 %v1050_v39  ;;  %v596_v53 = vmax.f32 %v530_v46, 0.0 }
 0x11b   : > { %v599_v52 = vmax.f32 %v541_v48, 0.0 }
 0x11c   : > { %v597_v54 = vmax.f32 %v533_v50, 0.0 }
 0x11d   : > { %v1058_v55 = vpack.c.bf16 %v599_v52, %v598_v51  ;;  %1053 = vmatpush3.bf16.msra.mxu1 %v1364_v43 }
 0x11e   : > { %v1054_v56 = vpack.c.bf16 %v597_v54, %v596_v53  ;;  %v1020_v59 = vpop.f32.mrb[24].mxu0 }
 0x11f   : > { %v554_v60 = vadd.f32 %v1020_v59, %v1358_v30  ;;  %v545_v61 = vpop.f32.mrb[25].mxu0 }
 0x120   : > { %v546_v62 = vadd.f32 %v1358_v30, %v545_v61  ;;  %v1021_v63 = vpop.f32.mrb[26].mxu0  ;;  %1055 = vmatprep.subr.bf16.mxu1 %v1054_v56 }
 0x121   : > { %v557_v45 = vadd.f32 %v1021_v63, %v1358_v30  ;;  %v548_v0 = vpop.f32.mrb[27].mxu0  ;;  %1057 = vmatpush3.bf16.msra.mxu1 %v1374_v58  ;;  %v602_v2 = vmax.f32 %v554_v60, 0.0 }
 0x122   : > { %v549_v1 = vadd.f32 %v1358_v30, %v548_v0  ;;  %1059 = vmatprep.subr.bf16.mxu1 %v1058_v55  ;;  %v600_v43 = vmax.f32 %v546_v62, 0.0 }
 0x123   : > { %v603_v3 = vmax.f32 %v557_v45, 0.0 }
 0x124   : > { %v601_v4 = vmax.f32 %v549_v1, 0.0 }
 0x125   : > { %v1066_v5 = vpack.c.bf16 %v603_v3, %v602_v2  ;;  %1061 = vmatpush3.bf16.msra.mxu1 %v1372_v57 }
 0x126   : > { %v1062_v6 = vpack.c.bf16 %v601_v4, %v600_v43  ;;  %v1024_v9 = vpop.f32.mrb[28].mxu0 }
 0x127   : > { %v570_v10 = vadd.f32 %v1024_v9, %v1358_v30  ;;  %v561_v11 = vpop.f32.mrb[29].mxu0 }
 0x128   : > { %v562_v12 = vadd.f32 %v1358_v30, %v561_v11  ;;  %v1025_v13 = vpop.f32.mrb[30].mxu0  ;;  %1063 = vmatprep.subr.bf16.mxu1 %v1062_v6 }
 0x129   : > { %v573_v58 = vadd.f32 %v1025_v13, %v1358_v30  ;;  %v564_v14 = vpop.f32.mrb[31].mxu0  ;;  %1065 = vmatpush3.bf16.msra.mxu1 %v1382_v8  ;;  %v606_v16 = vmax.f32 %v570_v10, 0.0  ;;  %v1140_v8 = vld [vmem:[%s1499_s3] sm:$0xff]  }
 0x12a   : > { %v565_v15 = vadd.f32 %v1358_v30, %v564_v14  ;;  %1067 = vmatprep.subr.bf16.mxu1 %v1066_v5  ;;  %v604_v57 = vmax.f32 %v562_v12, 0.0  ;;  %v1213_v30 = vmov 0.0  }
 0x12b   : > { %v607_v17 = vmax.f32 %v573_v58, 0.0 }
 0x12c   : > { %v605_v18 = vmax.f32 %v565_v15, 0.0 }
 0x12d   : > { %v1074_v19 = vpack.c.bf16 %v607_v17, %v606_v16  ;;  %1069 = vmatpush3.bf16.msra.mxu1 %v1380_v7  ;;  %v1141_v7 = vld [vmem:[%s1499_s3 + $0x8] sm:$0xff]  }
 0x12e   : > { %v1070_v20 = vpack.c.bf16 %v605_v18, %v604_v57 }
 0x130   : > { %1071 = vmatprep.subr.bf16.mxu1 %v1070_v20 }
 0x131   : > { %1073 = vmatpush3.bf16.msra.mxu1 %v1390_v22  ;;  %v1146_v22 = vld [vmem:[%s1499_s3 + $0x30] sm:$0xff]  }
 0x132   : > { %1075 = vmatprep.subr.bf16.mxu1 %v1074_v19 }
 0x135   : > { %1077 = vmatpush3.bf16.msra.mxu1 %v1388_v21  ;;  %v1142_v21 = vld [vmem:[%s1499_s3 + $0x10] sm:$0xff]  }
 0x136   : > { %1026 = vmatprep.subr.bf16.mxu1 %v1213_v30 }
 0x138   : > { %912 = vmatmul.mubr.msk.f32.vlgmr.msra.gmra.mrb[0].mxu1 %vm620_vm7, %v1212_v29  ;;  %v1145_v29 = vld [vmem:[%s1499_s3 + $0x28] sm:$0xff]  }
 0x139   : > { %1027 = vmatpush3.bf16.msra.mxu1 %v1140_v8  ;;  %1042 = vmatprep.mubr.msk.bf16.mxu1 %vm1214_vm8, %v1213_v30 }
 0x13a   : > { %1028 = vmatprep.subr.bf16.mxu1 %v1213_v30 }
 0x13d   : > { %1029 = vmatpush3.bf16.msra.mxu1 %v1141_v7 }
 0x13e   : > { %1030 = vmatprep.subr.bf16.mxu1 %v1213_v30 }
 0x141   : > { %1031 = vmatpush3.bf16.msra.mxu1 %v1142_v21 }
 0x142   : > { %1032 = vmatprep.subr.bf16.mxu1 %v1213_v30 }
 0x145   : > { %1033 = vmatpush3.bf16.msra.mxu1 %v1143_v27 }
 0x146   : > { %1034 = vmatprep.subr.bf16.mxu1 %v1213_v30 }
 0x149   : > { %1035 = vmatpush3.bf16.msra.mxu1 %v1144_v28 }
 0x14a   : > { %1036 = vmatprep.subr.bf16.mxu1 %v1213_v30 }
 0x14d   : > { %1037 = vmatpush3.bf16.msra.mxu1 %v1145_v29 }
 0x14e   : > { %1038 = vmatprep.subr.bf16.mxu1 %v1213_v30 }
 0x151   : > { %1039 = vmatpush3.bf16.msra.mxu1 %v1146_v22 }
 0x152   : > { %1040 = vmatprep.subr.bf16.mxu1 %v1213_v30 }
 0x155   : > { %1041 = vmatpush3.bf16.msra.mxu1 %v1147_v23 }
 0x20b   : > { %v976_v24 = vpop.f32.mrb[0].mxu1 }
 0x20c   : > { %v977_v25 = vpop.f32.mrb[1].mxu1 }
 0x20d   : > { %v978_v26 = vadd.f32 %v977_v25, %v976_v24 }
 0x20f   : > { %v694_v31 = vpack.c.bf16 %v978_v26, %v978_v26 }
 0x211   : > { %1043 = vmatmul.mubr.bf16.vlgmr.msra.gmra.mrb[4].mxu1 %v694_v31 }
 0x2e4   : > { %v794_v33 = vpop.f32.mrb[4].mxu1 }
 0x2e5   : > { %v795_v34 = vadd.f32 %v794_v33, %v711_v32  ;;  %v1044_v35 = vpop.f32.mrb[5].mxu1 }
 0x2e6   : > { %v797_v36 = vpop.f32.mrb[6].mxu1 }
 0x2e7   : > { %800 = vst [vmem:[%s216_s6] sm:$0x1] %v795_v34  ;;  %v1045_v37 = vpop.f32.mrb[7].mxu1 }
 0x2e8   : > { %1161 = shalt.err (!%p1158_p3)
}
 0x2e9   : > { %s1162_s15 = scalar_lea.hbm %s1454_s10, 16  ;;  %s1166_s23 = scalar_lea.hbm %s1501_s5, 32 }
 0x2ea   : > { %p1163_p4 = scmp.ne.s32.totalorder %s1454_s10, %s1162_s15  ;;  %p1167_p9 = scmp.lt.u32.totalorder %s1454_s10, %s1501_s5 }
 0x2eb   : > { %p1168_p10 = scmp.lt.u32.totalorder %s1166_s23, %s1162_s15  ;;  %p1170_p12 = scmp.lt.u32.totalorder %s1162_s15, %s1454_s10 }
 0x2ec   : > { %p1164_p7 = pnand %p1163_p4, %p1284_p5 }
 0x2ed   : > { %p1169_p11 = por %p1168_p10, %p1167_p9 }
 0x2ee   : > { %p1165_p8 = pneg %p1164_p7 }
 0x2ef   : > { %p1171_p13 = por %p1170_p12, %p1169_p11 }
 0x2f1   : > { %p1172_p0 = pnand %p1171_p13, %p1165_p8 }
 0x2f3   : > { %1175 = shalt.err (!%p1172_p0)
}
 0x2f4   : > { %1079 = dma.vmem_to_hbm [thread:$0]  (%p1284_p5), %s1456_s7, 16, %s1454_s10, %s802_s11  }
 0x2f5 PF: > { %p1085_p1 = scmp.ge.s32.totalorder %s1210_s21, 2  ;;  %s826_s30 = sand.u32 1, %s1198_s18  }
 0x2f6   : > { %s827_s6 = scalar_lea.sflag [#allocation3], %s826_s30 }
 0x2f7   : > { %p1082_p2 = pnand %p1085_p1, %p1288_p6 }
 0x2f9   : > { %1193 = dma.done.wait (!%p1082_p2), %s827_s6, 16  }
 0x2fa   : > { %1195 = vsyncadd (!%p1082_p2), %s827_s6, 4294967280  ;;  %p15_p3 = scmp.ge.s32.totalorder %s1271_s24, 4   ;;  %s1508_s18 = smov %s1202_s19 }
 0x2fb   : > { %s1509_s19 = smov %s1206_s20  ;;  %s1510_s20 = smov %s1282_s27 }
 0x2fc   : > { %s1511_s21 = smov %s1271_s24  ;;  %17 = sbr.rel (!%p15_p3) target bundleno = 3 (0x3), region = 75 }
 0x303   :  { %831 = vsyncpa [#allocation3], 1 }
 0x304   :  { %833 = vsyncpa [#allocation3 + $0x1], 1 }

</bundles_post_ra>
